<compile_context>
chip_gen: v7x
topology: tpu7x:2x2x1
jax: 0.10.0
libtpu: 0.0.40
codegen_flags: <defaults>
</compile_context>

<pallas_src>
import functools

import jax
import jax.numpy as jnp
from jax.experimental import pallas as pl
from jax.experimental.pallas import tpu as pltpu


def _round_up(v, m):
    return ((v + m - 1) // m) * m


def _tpu_vmem_capacity():
    """Per-TC VMEM capacity in bytes (falls back to 128 MiB if unknown)."""
    try:
        info = pltpu.get_tpu_info()
        cap = getattr(info, "vmem_capacity_bytes", None)
        if cap:
            return int(cap)
    except Exception:
        pass
    return 128 << 20


def _default_tile_i(I, vmem_cap):
    # 512 on 128-MiB parts (v5e/v6e); 256 on 64-MiB parts (v7x) to halve the
    # weight-block footprint (intensity depends only on tile_m anyway).
    ti = 512 if vmem_cap > (64 << 20) else 256
    return max(128, min(ti, _round_up(I, 128)))


def _vmem_estimate(tile_m, tile_i, H, itemsize, out_itemsize):
    """Honest per-step VMEM footprint estimate (bytes)."""
    dbl_in = 2 * (tile_m * H + H * 2 * tile_i + tile_i * H) * itemsize  # dbl-buffered inputs
    dbl_out = 2 * tile_m * H * out_itemsize                             # dbl-buffered output
    acc = tile_m * H * 4                                                # f32 accumulator scratch
    inter = tile_m * 2 * tile_i * 4                                     # gu (f32)
    inter += 3 * tile_m * tile_i * 4                                    # g, u, silu temps (f32)
    inter += tile_m * tile_i * itemsize                                 # h cast for down matmul
    return dbl_in + dbl_out + acc + inter


def _select_tile_m(M, H, tile_i, compute_dtype, out_dtype, tile_m=None):
    """Pick the token tile: as large as the VMEM budget allows, sublane/MXU
    aligned, and split so both TensorCores stay busy (v7x)."""
    itemsize = jnp.dtype(compute_dtype).itemsize
    out_itemsize = jnp.dtype(out_dtype).itemsize
    gran_m = {1: 32, 2: 16, 4: 8}.get(itemsize, 8)   # packed-sublane granularity

    vmem_cap = _tpu_vmem_capacity()
    budget = int(vmem_cap * 0.85)                    # ~15% headroom for compiler scratch

    if tile_m is None:
        tile_m = 512
    # Keep num_m >= 2 whenever M permits so the "parallel" axis shards across
    # both TensorCores (v7x megacore); no-op on single-TC chips.
    if M > 2 * 256:
        tile_m = min(tile_m, _round_up(pl.cdiv(M, 2), 256))
    tile_m = min(tile_m, _round_up(M, gran_m))
    if tile_m >= 256:
        tile_m = _round_up(tile_m, 256)              # whole 256x256 MXU passes (v6e/v7x)
    else:
        tile_m = max(gran_m, _round_up(tile_m, gran_m))

    # Shrink tile_m (never tile_i; it is baked into the fused weight layout)
    # until the honest footprint fits the budget.
    while tile_m > gran_m and _vmem_estimate(tile_m, tile_i, H, itemsize, out_itemsize) > budget:
        tile_m = max(gran_m, _round_up(tile_m // 2, gran_m))

    return tile_m, budget


def _swiglu_kernel(x_ref, wgu_ref, wd_ref, o_ref, acc_ref, *, tile_i):
    # x_ref  : (tm, H)          token tile (compute_dtype)
    # wgu_ref: (H, 2*tile_i)    fused [gate | up] weight tile (compute_dtype)
    # wd_ref : (tile_i, H)      down_proj weight tile (compute_dtype)
    # o_ref  : (tm, H)          output tile (out dtype)
    # acc_ref: (tm, H) f32      down-projection accumulator (VMEM scratch)
    j = pl.program_id(1)

    @pl.when(j == 0)
    def _():
        acc_ref[...] = jnp.zeros_like(acc_ref)

    x = x_ref[...]
    # One MXU pass produces both projections for this I-tile (f32 accumulate).
    gu = jnp.dot(x, wgu_ref[...], preferred_element_type=jnp.float32)  # (tm, 2*ti)
    g = gu[:, :tile_i]
    u = gu[:, tile_i:]
    h = (g * jax.nn.sigmoid(g)) * u              # SiLU * up in f32 (VPU/EUP)

    acc_ref[...] += jnp.dot(h.astype(wd_ref.dtype), wd_ref[...],
                            preferred_element_type=jnp.float32)

    @pl.when(j == pl.num_programs(1) - 1)
    def _():
        o_ref[...] = acc_ref[...].astype(o_ref.dtype)


def prepare_swiglu_weights(w_gate, w_up, w_down, *, tile_i=None,
                           compute_dtype=jnp.bfloat16):
    """One-time parameter transformation -- do this at parameter-load time.

    PyTorch nn.Linear layout: w_gate/w_up are [I, H], w_down is [H, I].
    Returns:
      w_gu   : (H, 2*I_pad) with per-tile_i layout [gate_tile | up_tile]
      wd_t   : (I_pad, H)
      tile_i : the I-tile the layout was built for (pass to swiglu_fused_forward)
    """
    I, H = w_gate.shape
    if tile_i is None:
        tile_i = _default_tile_i(I, _tpu_vmem_capacity())
    tile_i = max(128, min(_round_up(tile_i, 128), _round_up(I, 128)))

    I_pad = _round_up(I, tile_i)
    num_i = I_pad // tile_i

    wg_t = jnp.pad(w_gate.T.astype(compute_dtype), ((0, 0), (0, I_pad - I)))
    wu_t = jnp.pad(w_up.T.astype(compute_dtype), ((0, 0), (0, I_pad - I)))
    wd_t = jnp.pad(w_down.T.astype(compute_dtype), ((0, I_pad - I), (0, 0)))

    # Interleave per I-tile so each grid step reads one contiguous (H, 2*tile_i)
    # block containing [gate_cols_j | up_cols_j].
    w_gu = jnp.concatenate(
        [wg_t.reshape(H, num_i, tile_i), wu_t.reshape(H, num_i, tile_i)],
        axis=-1,
    ).reshape(H, 2 * I_pad)
    return w_gu, wd_t, tile_i


def swiglu_fused_forward(x, w_gu, wd_t, *, tile_i, tile_m=None, out_dtype=None):
    """Forward pass with PRE-FUSED weights (weight prep hoisted out of this path).

    x    : [B, S, H]
    w_gu : (H, 2*I_pad)  from prepare_swiglu_weights
    wd_t : (I_pad, H)    from prepare_swiglu_weights
    """
    B, S, H = x.shape
    assert w_gu.shape[0] == H and wd_t.shape[1] == H
    I_pad = wd_t.shape[0]
    assert w_gu.shape[1] == 2 * I_pad and I_pad % tile_i == 0
    num_i = I_pad // tile_i

    M = B * S
    compute_dtype = w_gu.dtype
    if out_dtype is None:
        out_dtype = x.dtype

    tile_m, vmem_limit = _select_tile_m(M, H, tile_i, compute_dtype, out_dtype,
                                        tile_m=tile_m)
    num_m = pl.cdiv(M, tile_m)
    M_pad = num_m * tile_m

    # Token slab, zero-padded to a whole number of tiles (ragged M support).
    x2d = x.reshape(M, H).astype(compute_dtype)
    if M_pad != M:
        x2d = jnp.pad(x2d, ((0, M_pad - M), (0, 0)))

    # Advisory cost hint for XLA scheduling around the custom call.
    cost = pl.CostEstimate(
        flops=6 * M_pad * H * I_pad,
        transcendentals=M_pad * I_pad,
        bytes_accessed=(x2d.size * x2d.dtype.itemsize
                        + num_m * (w_gu.size + wd_t.size) * jnp.dtype(compute_dtype).itemsize
                        + M_pad * H * jnp.dtype(out_dtype).itemsize),
    )

    kernel = functools.partial(_swiglu_kernel, tile_i=tile_i)

    out = pl.pallas_call(
        kernel,
        out_shape=jax.ShapeDtypeStruct((M_pad, H), out_dtype),
        grid_spec=pltpu.PrefetchScalarGridSpec(
            num_scalar_prefetch=0,
            grid=(num_m, num_i),
            in_specs=[
                pl.BlockSpec((tile_m, H), lambda i, j: (i, 0)),      # x tile
                pl.BlockSpec((H, 2 * tile_i), lambda i, j: (0, j)),  # fused gate|up tile
                pl.BlockSpec((tile_i, H), lambda i, j: (j, 0)),      # down tile
            ],
            out_specs=pl.BlockSpec((tile_m, H), lambda i, j: (i, 0)),
            scratch_shapes=[pltpu.VMEM((tile_m, H), jnp.float32)],   # f32 acc
        ),
        compiler_params=pltpu.CompilerParams(
            dimension_semantics=("parallel", "arbitrary"),
            vmem_limit_bytes=int(vmem_limit),
        ),
        cost_estimate=cost,
    )(x2d, w_gu, wd_t)

    return out[:M].reshape(B, S, H)


def llama_mlp_swiglu(x, w_gate, w_up, w_down, *, tile_m=None, tile_i=None,
                     compute_dtype=jnp.bfloat16):
    """Convenience wrapper matching LlamaMLP.forward with raw nn.Linear weights.

    NOTE: this re-fuses the weights every call; in production call
    prepare_swiglu_weights once at load time and use swiglu_fused_forward.
    """
    w_gu, wd_t, ti = prepare_swiglu_weights(
        w_gate, w_up, w_down, tile_i=tile_i, compute_dtype=compute_dtype)
    return swiglu_fused_forward(x, w_gu, wd_t, tile_i=ti, tile_m=tile_m)


def _reference(x, w_gate, w_up, w_down):
    g = jnp.einsum("bsh,ih->bsi", x, w_gate)
    u = jnp.einsum("bsh,ih->bsi", x, w_up)
    h = (g * jax.nn.sigmoid(g)) * u
    return jnp.einsum("bsi,hi->bsh", h, w_down)


if __name__ == "__main__":
    # Small LLaMA-like config: hidden_size=128, intermediate_size=256
    B, S, H, I = 2, 64, 128, 256

    key = jax.random.PRNGKey(0)
    kx, kg, ku, kd, kx2 = jax.random.split(key, 5)

    x = jax.random.normal(kx, (B, S, H), dtype=jnp.float32)
    # nn.Linear weight layout: [out_features, in_features]
    w_gate = jax.random.normal(kg, (I, H), dtype=jnp.float32) * 0.05
    w_up = jax.random.normal(ku, (I, H), dtype=jnp.float32) * 0.05
    w_down = jax.random.normal(kd, (H, I), dtype=jnp.float32) * 0.05

    ref = _reference(x, w_gate, w_up, w_down)

    # 1) Production path: one-time weight prep (hoisted), bf16 matmuls with
    #    f32 accumulation.  (h is cast to bf16 before the down projection --
    #    expected precision loss, hence the loose tolerance.)
    w_gu, wd_t, ti = prepare_swiglu_weights(w_gate, w_up, w_down)
    out = jax.block_until_ready(swiglu_fused_forward(x, w_gu, wd_t, tile_i=ti))
    assert out.shape == (B, S, H)
    assert jnp.allclose(out.astype(jnp.float32), ref, atol=1e-1, rtol=1e-1), \
        "bf16 mismatch vs reference"

    # Second forward reuses the same pre-fused weights (no per-call re-layout).
    x2 = jax.random.normal(kx2, (B, S, H), dtype=jnp.float32)
    out2 = jax.block_until_ready(swiglu_fused_forward(x2, w_gu, wd_t, tile_i=ti))
    ref2 = _reference(x2, w_gate, w_up, w_down)
    assert jnp.allclose(out2.astype(jnp.float32), ref2, atol=1e-1, rtol=1e-1), \
        "bf16 mismatch vs reference (2nd call)"

    # 2) f32 compute path (tight tolerance vs reference).
    out_f32 = jax.block_until_ready(
        llama_mlp_swiglu(x, w_gate, w_up, w_down, compute_dtype=jnp.float32))
    assert jnp.allclose(out_f32, ref, atol=1e-4, rtol=1e-4), "f32 mismatch vs reference"

    # 3) Ragged token count (exercises cdiv grid + zero-padding path).
    x_odd = jax.random.normal(kx, (1, 5, H), dtype=jnp.float32)
    out_odd = jax.block_until_ready(
        llama_mlp_swiglu(x_odd, w_gate, w_up, w_down, compute_dtype=jnp.float32))
    ref_odd = _reference(x_odd, w_gate, w_up, w_down)
    assert jnp.allclose(out_odd, ref_odd, atol=1e-4, rtol=1e-4), "ragged mismatch"

    print("KERNEL_OK")
</pallas_src>

<mosaic_0001>
module attributes {stable_mosaic.version = 11 : i64} {
  func.func @_swiglu_kernel(%arg0: i32, %arg1: i32, %arg2: memref<128x128xbf16, #tpu.memory_space<vmem>>, %arg3: memref<128x512xbf16, #tpu.memory_space<vmem>>, %arg4: memref<256x128xbf16, #tpu.memory_space<vmem>>, %arg5: memref<128x128xf32, #tpu.memory_space<vmem>>, %arg6: memref<128x128xf32, #tpu.memory_space<vmem>>) attributes {dimension_semantics = [#tpu.dimension_semantics<parallel>, #tpu.dimension_semantics<arbitrary>], iteration_bounds = array<i64: 1, 1>, scalar_prefetch = 0 : i64, scratch_operands = 1 : i64, tpu.core_type = #tpu.core_type<tc>, window_params = [{transform_indices = @transform_0, window_bounds = array<i64: 128, 128>}, {transform_indices = @transform_1, window_bounds = array<i64: 128, 512>}, {transform_indices = @transform_2, window_bounds = array<i64: 256, 128>}, {transform_indices = @transform_3, window_bounds = array<i64: 128, 128>}]} {
    %c0_i32 = arith.constant 0 : i32
    %0 = arith.cmpi eq, %arg1, %c0_i32 : i32
    %1 = arith.extui %0 : i1 to i32
    %c0_i32_0 = arith.constant 0 : i32
    %2 = arith.cmpi ne, %1, %c0_i32_0 : i32
    scf.if %2 {
      %cst_14 = arith.constant 0.000000e+00 : f32
      %24 = vector.broadcast %cst_14 : f32 to vector<128x128xf32>
      %c0_15 = arith.constant 0 : index
      %c0_16 = arith.constant 0 : index
      %25 = vector.load %arg6[%c0_15, %c0_16] : memref<128x128xf32, #tpu.memory_space<vmem>>, vector<128x128xf32>
      tpu.vector_store %arg6[%c0_15, %c0_16], %24 {strides = array<i32>} : memref<128x128xf32, #tpu.memory_space<vmem>>, vector<128x128xf32>,
    } else {
    }
    %c0 = arith.constant 0 : index
    %c0_1 = arith.constant 0 : index
    %3 = vector.load %arg2[%c0, %c0_1] : memref<128x128xbf16, #tpu.memory_space<vmem>>, vector<128x128xbf16>
    %c0_2 = arith.constant 0 : index
    %c0_3 = arith.constant 0 : index
    %4 = vector.load %arg3[%c0_2, %c0_3] : memref<128x512xbf16, #tpu.memory_space<vmem>>, vector<128x512xbf16>
    %cst = arith.constant dense<0.000000e+00> : vector<128x512xf32>
    %5 = tpu.matmul %3, %4, %cst {dimension_numbers = #tpu.dot_dimension_numbers<[1], [0], [0], [1], [0, 0, 1, 1], [], []>} : vector<128x128xbf16>, vector<128x512xbf16>, vector<128x512xf32> -> vector<128x512xf32>
    %6 = vector.extract_strided_slice %5 {offsets = [0, 0], sizes = [128, 256], strides = [1, 1]} : vector<128x512xf32> to vector<128x256xf32>
    %7 = vector.extract_strided_slice %5 {offsets = [0, 256], sizes = [128, 256], strides = [1, 1]} : vector<128x512xf32> to vector<128x256xf32>
    %8 = arith.negf %6 : vector<128x256xf32>
    %9 = math.exp %8 : vector<128x256xf32>
    %cst_4 = arith.constant 1.000000e+00 : f32
    %10 = vector.broadcast %cst_4 : f32 to vector<128x256xf32>
    %11 = arith.addf %10, %9 : vector<128x256xf32>
    %12 = arith.divf %10, %11 : vector<128x256xf32>
    %13 = arith.mulf %6, %12 : vector<128x256xf32>
    %14 = arith.mulf %13, %7 : vector<128x256xf32>
    %c0_5 = arith.constant 0 : index
    %c0_6 = arith.constant 0 : index
    %15 = vector.load %arg6[%c0_5, %c0_6] : memref<128x128xf32, #tpu.memory_space<vmem>>, vector<128x128xf32>
    %16 = arith.truncf %14 : vector<128x256xf32> to vector<128x256xbf16>
    %c0_7 = arith.constant 0 : index
    %c0_8 = arith.constant 0 : index
    %17 = vector.load %arg4[%c0_7, %c0_8] : memref<256x128xbf16, #tpu.memory_space<vmem>>, vector<256x128xbf16>
    %cst_9 = arith.constant dense<0.000000e+00> : vector<128x128xf32>
    %18 = tpu.matmul %16, %17, %cst_9 {dimension_numbers = #tpu.dot_dimension_numbers<[1], [0], [0], [1], [0, 0, 1, 1], [], []>} : vector<128x256xbf16>, vector<256x128xbf16>, vector<128x128xf32> -> vector<128x128xf32>
    %19 = arith.addf %15, %18 : vector<128x128xf32>
    %c0_10 = arith.constant 0 : index
    %c0_11 = arith.constant 0 : index
    %20 = vector.load %arg6[%c0_10, %c0_11] : memref<128x128xf32, #tpu.memory_space<vmem>>, vector<128x128xf32>
    tpu.vector_store %arg6[%c0_10, %c0_11], %19 {strides = array<i32>} : memref<128x128xf32, #tpu.memory_space<vmem>>, vector<128x128xf32>,
    %c0_i32_12 = arith.constant 0 : i32
    %21 = arith.cmpi eq, %arg1, %c0_i32_12 : i32
    %22 = arith.extui %21 : i1 to i32
    %c0_i32_13 = arith.constant 0 : i32
    %23 = arith.cmpi ne, %22, %c0_i32_13 : i32
    scf.if %23 {
      %c0_14 = arith.constant 0 : index
      %c0_15 = arith.constant 0 : index
      %24 = vector.load %arg6[%c0_14, %c0_15] : memref<128x128xf32, #tpu.memory_space<vmem>>, vector<128x128xf32>
      %c0_16 = arith.constant 0 : index
      %c0_17 = arith.constant 0 : index
      %25 = vector.load %arg5[%c0_16, %c0_17] : memref<128x128xf32, #tpu.memory_space<vmem>>, vector<128x128xf32>
      tpu.vector_store %arg5[%c0_16, %c0_17], %24 {strides = array<i32>} : memref<128x128xf32, #tpu.memory_space<vmem>>, vector<128x128xf32>,
    } else {
    }
    return
  }
  func.func @transform_0(%arg0: i32, %arg1: i32) -> (i32, i32) {
    %c0_i32 = arith.constant 0 : i32
    %c0_i32_0 = arith.constant 0 : i32
    return %arg0, %c0_i32 : i32, i32
  }
  func.func @transform_1(%arg0: i32, %arg1: i32) -> (i32, i32) {
    %c0_i32 = arith.constant 0 : i32
    %c0_i32_0 = arith.constant 0 : i32
    return %c0_i32, %arg1 : i32, i32
  }
  func.func @transform_2(%arg0: i32, %arg1: i32) -> (i32, i32) {
    %c0_i32 = arith.constant 0 : i32
    %c0_i32_0 = arith.constant 0 : i32
    return %arg1, %c0_i32 : i32, i32
  }
  func.func @transform_3(%arg0: i32, %arg1: i32) -> (i32, i32) {
    %c0_i32 = arith.constant 0 : i32
    %c0_i32_0 = arith.constant 0 : i32
    return %arg0, %c0_i32 : i32, i32
  }
}

</mosaic_0001>

<bundles_post_ra>
// kernel: tpu_custom_call.1
= control target key start
LH: loop header
LB: loop body
LE: loop exit
PB: predicated region body
PF: predicated region fallthrough
CT: control target
= control target key end

     0   :  { %8 = vsyncpa [#allocation4], 0  ;;  %s1920_s0 = inlined_call_operand.hbm [shape: bf16[128,128], index: 0, kind: input, shape index: {}]   ;;  %s1921_s1 = inlined_call_operand.hbm [shape: bf16[128,512], index: 1, kind: input, shape index: {}]   ;;  %s1922_s2 = inlined_call_operand.hbm [shape: bf16[256,128], index: 2, kind: input, shape index: {}]   ;;  %s1923_s3 = inlined_call_operand.hbm [shape: f32[128,128], index: 3, kind: output, shape index: {}]  }
   0x1   :  { %9 = vsyncpa [#allocation7], 0 }
   0x2   :  { %10 = vsyncpa [#allocation5], 0  ;;  %s1630_s12 = smov [#allocation6]   ;;  %s1536_s16 = scalar_lea.hbm %s1921_s1, 4096 }
   0x3   :  { %s28_s13 = sshll.u32 %s1630_s12, 4  ;;  %p1537_p0 = scmp.ne.s32.totalorder %s1921_s1, %s1536_s16  ;;  %s29_s13 = int_to_ptr.vmem [resolvable:$true] %s28_s13 }
   0x4   :  { %p1540_p1 = scmp.lt.u32.totalorder %s1536_s16, %s1921_s1 }
   0x6   :  { %p1542_p2 = pnand %p1540_p1, %p1537_p0 }
   0x8   :  { %1545 = shalt.err (!%p1542_p2)
}
   0x9   :  { %s1546_s21 = scalar_lea.vmem %s29_s13, 4096  ;;  %p1551_p4 = scmp.lt.s32.totalorder %s29_s13, %s29_s13 }
   0xa   :  { %p1547_p3 = scmp.ne.s32.totalorder %s29_s13, %s1546_s21  ;;  %p1552_p5 = scmp.lt.s32.totalorder %s1546_s21, %s1546_s21 }
   0xc   :  { %p1553_p6 = por %p1552_p5, %p1551_p4 }
   0xe   :  { %p1554_p7 = pnand %p1553_p6, %p1547_p3 }
  0x10   :  { %1557 = shalt.err (!%p1554_p7)
}
  0x11   :  { %s1631_s22 = smov 256   ;;  %s1632_s23 = smov 16  }
  0x12   :  { %34 = dma.hbm_to_vmem [thread:$0]  %s1921_s1, 4096, %s29_s13, [#allocation7], %s1631_s22, %s1631_s22, %s1632_s23  }
  0x13   :  { %s1633_s26 = smov [#allocation3]   ;;  %s1558_s30 = scalar_lea.hbm %s1920_s0, 1024 }
  0x14   :  { %s16_s27 = sshll.u32 %s1633_s26, 4  ;;  %p1559_p8 = scmp.ne.s32.totalorder %s1920_s0, %s1558_s30  ;;  %s17_s27 = int_to_ptr.vmem [resolvable:$true] %s16_s27 }
  0x15   :  { %p1562_p9 = scmp.lt.u32.totalorder %s1558_s30, %s1920_s0 }
  0x17   :  { %p1564_p10 = pnand %p1562_p9, %p1559_p8 }
  0x19   :  { %1567 = shalt.err (!%p1564_p10)
}
  0x1a   :  { %s1568_s8 = scalar_lea.vmem %s17_s27, 1024  ;;  %p1573_p12 = scmp.lt.s32.totalorder %s17_s27, %s17_s27 }
  0x1b   :  { %p1569_p11 = scmp.ne.s32.totalorder %s17_s27, %s1568_s8  ;;  %p1574_p13 = scmp.lt.s32.totalorder %s1568_s8, %s1568_s8 }
  0x1d   :  { %p1575_p0 = por %p1574_p13, %p1573_p12 }
  0x1f   :  { %p1576_p1 = pnand %p1575_p0, %p1569_p11 }
  0x21   :  { %1579 = shalt.err (!%p1576_p1)
}
  0x22   :  { %s1634_s1 = smov 64   ;;  %s1635_s9 = smov 4  }
  0x23   :  { %22 = dma.hbm_to_vmem [thread:$0]  %s1920_s0, 1024, %s17_s27, [#allocation4], %s1634_s1, %s1634_s1, %s1635_s9  }
  0x24   :  { %s1636_s12 = smov [#allocation8]   ;;  %s1580_s16 = scalar_lea.hbm %s1922_s2, 2048 }
  0x25   :  { %s40_s13 = sshll.u32 %s1636_s12, 4  ;;  %p1581_p2 = scmp.ne.s32.totalorder %s1922_s2, %s1580_s16  ;;  %s41_s13 = int_to_ptr.vmem [resolvable:$true] %s40_s13 }
  0x26   :  { %p1584_p3 = scmp.lt.u32.totalorder %s1580_s16, %s1922_s2 }
  0x28   :  { %p1586_p4 = pnand %p1584_p3, %p1581_p2 }
  0x2a   :  { %1589 = shalt.err (!%p1586_p4)
}
  0x2b   :  { %s1590_s21 = scalar_lea.vmem %s41_s13, 2048  ;;  %p1595_p6 = scmp.lt.s32.totalorder %s41_s13, %s41_s13 }
  0x2c   :  { %p1591_p5 = scmp.ne.s32.totalorder %s41_s13, %s1590_s21  ;;  %p1596_p7 = scmp.lt.s32.totalorder %s1590_s21, %s1590_s21 }
  0x2e   :  { %p1597_p8 = por %p1596_p7, %p1595_p6 }
  0x30   :  { %p1598_p9 = pnand %p1597_p8, %p1591_p5 }
  0x32   :  { %1601 = shalt.err (!%p1598_p9)
}
  0x33   :  { %46 = dma.hbm_to_vmem [thread:$0]  %s1922_s2, 2048, %s41_s13, [#allocation7], %s1634_s1, %s1634_s1, %s1635_s9  }
  0x34   :  { %1624 = dma.done.wait [#allocation4], 1024  }
  0x35   :  { %1625 = vsyncadd [#allocation4], 4294966272 }
  0x36   :  { %1626 = dma.done.wait [#allocation7], 6144  }
  0x37   :  { %1627 = vsyncadd [#allocation7], 4294961152  ;;  %v1637_v0 = vmov 0   ;;  %v1336_v1 = vld [vmem:[#allocation6 + $0x4] ss:$16 sps:$4 sm:$0xff]   ;;  %v1368_v24 = vld [vmem:[#allocation3 + $0x8] sm:$0xff]  }
  0x38   :  { %365 = vmatprep.mubr.bf16.mxu0 %v1637_v0  ;;  %405 = vmatprep.mubr.bf16.mxu1 %v1637_v0  ;;  %v1338_v2 = vld [vmem:[#allocation6] ss:$16 sps:$4 sm:$0xff]   ;;  %v1339_v3 = vld [vmem:[#allocation6 + $0x24] ss:$16 sps:$4 sm:$0xff]   ;;  %v1364_v19 = vld [vmem:[#allocation6 + $0xc] ss:$16 sps:$4 sm:$0xff]  }
  0x39   :  { %333 = vmatprep.subr.bf16.mxu0 %v1336_v1  ;;  %1309 = vmatprep.subr.bf16.mxu1 %v1336_v1  ;;  %v1341_v4 = vld [vmem:[#allocation6 + $0x20] ss:$16 sps:$4 sm:$0xff]   ;;  %v1342_v5 = vld [vmem:[#allocation6 + $0x44] ss:$16 sps:$4 sm:$0xff]   ;;  %v1362_v20 = vld [vmem:[#allocation6 + $0x8] ss:$16 sps:$4 sm:$0xff]  }
  0x3a   :  { %334 = vmatpush1.bf16.msra.mxu0 %v1338_v2  ;;  %1317 = vmatpush1.bf16.msra.mxu1 %v1338_v2  ;;  %v1344_v6 = vld [vmem:[#allocation6 + $0x40] ss:$16 sps:$4 sm:$0xff]   ;;  %v1345_v7 = vld [vmem:[#allocation6 + $0x64] ss:$16 sps:$4 sm:$0xff]   ;;  %v1367_v21 = vld [vmem:[#allocation6 + $0x2c] ss:$16 sps:$4 sm:$0xff]  }
  0x3b   :  { %335 = vmatprep.subr.bf16.mxu0 %v1339_v3  ;;  %1310 = vmatprep.subr.bf16.mxu1 %v1339_v3  ;;  %v1347_v8 = vld [vmem:[#allocation6 + $0x60] ss:$16 sps:$4 sm:$0xff]   ;;  %v1348_v9 = vld [vmem:[#allocation6 + $0x84] ss:$16 sps:$4 sm:$0xff]   ;;  %v1365_v22 = vld [vmem:[#allocation6 + $0x28] ss:$16 sps:$4 sm:$0xff]  }
  0x3c   :  { %v1350_v10 = vld [vmem:[#allocation6 + $0x80] ss:$16 sps:$4 sm:$0xff]   ;;  %v1351_v11 = vld [vmem:[#allocation6 + $0xa4] ss:$16 sps:$4 sm:$0xff]   ;;  %v1372_v23 = vld [vmem:[#allocation6 + $0x4c] ss:$16 sps:$4 sm:$0xff]  }
  0x3d   :  { %v1353_v12 = vld [vmem:[#allocation6 + $0xa0] ss:$16 sps:$4 sm:$0xff]   ;;  %v1354_v13 = vld [vmem:[#allocation6 + $0xc4] ss:$16 sps:$4 sm:$0xff]   ;;  %v1369_v25 = vld [vmem:[#allocation3 + $0x28] sm:$0xff]   ;;  %s1638_s2 = smov [#allocation9]  }
  0x3e   :  { %336 = vmatpush1.bf16.msra.mxu0 %v1341_v4  ;;  %1318 = vmatpush1.bf16.msra.mxu1 %v1341_v4  ;;  %v1356_v14 = vld [vmem:[#allocation6 + $0xc0] ss:$16 sps:$4 sm:$0xff]   ;;  %v1357_v15 = vld [vmem:[#allocation6 + $0xe4] ss:$16 sps:$4 sm:$0xff]   ;;  %v1370_v26 = vld [vmem:[#allocation6 + $0x48] ss:$16 sps:$4 sm:$0xff]  }
  0x3f   :  { %337 = vmatprep.subr.bf16.mxu0 %v1342_v5  ;;  %1311 = vmatprep.subr.bf16.mxu1 %v1342_v5  ;;  %v1359_v16 = vld [vmem:[#allocation6 + $0xe0] ss:$16 sps:$4 sm:$0xff]   ;;  %v1375_v27 = vld [vmem:[#allocation6 + $0x6c] ss:$16 sps:$4 sm:$0xff]   ;;  %v1373_v28 = vld [vmem:[#allocation6 + $0x68] ss:$16 sps:$4 sm:$0xff]  }
  0x40   :  { %v1360_v17 = vld [vmem:[#allocation3] sm:$0xff]   ;;  %v1380_v29 = vld [vmem:[#allocation6 + $0x8c] ss:$16 sps:$4 sm:$0xff]   ;;  %v1376_v30 = vld [vmem:[#allocation3 + $0x10] sm:$0xff]   ;;  %s1144_s23 = sshll.u32 %s1638_s2, 4  ;;  %s1145_s23 = int_to_ptr.vmem [resolvable:$true] %s1144_s23 }
  0x41   :  { %v1699_v18 = vld [vmem:[#allocation3 + $0x20] sm:$0xff]   ;;  %v1377_v31 = vld [vmem:[#allocation3 + $0x30] sm:$0xff]   ;;  %v1378_v32 = vld [vmem:[#allocation6 + $0x88] ss:$16 sps:$4 sm:$0xff]   ;;  %s1602_s24 = scalar_lea.vmem %s1145_s23, 2048  ;;  %p1607_p11 = scmp.lt.s32.totalorder %s1145_s23, %s1145_s23 }
  0x42   :  { %338 = vmatpush1.bf16.msra.mxu0 %v1344_v6  ;;  %1319 = vmatpush1.bf16.msra.mxu1 %v1344_v6  ;;  %v1383_v33 = vld [vmem:[#allocation6 + $0xac] ss:$16 sps:$4 sm:$0xff]   ;;  %v1381_v34 = vld [vmem:[#allocation6 + $0xa8] ss:$16 sps:$4 sm:$0xff]   ;;  %v1392_v41 = vld [vmem:[#allocation8 + $0x40] sm:$0xff]   ;;  %p1603_p10 = scmp.ne.s32.totalorder %s1145_s23, %s1602_s24  ;;  %p1608_p12 = scmp.lt.s32.totalorder %s1602_s24, %s1602_s24 }
  0x43   :  { %339 = vmatprep.subr.bf16.mxu0 %v1345_v7  ;;  %1312 = vmatprep.subr.bf16.mxu1 %v1345_v7  ;;  %v1388_v35 = vld [vmem:[#allocation6 + $0xcc] ss:$16 sps:$4 sm:$0xff]   ;;  %v1386_v38 = vld [vmem:[#allocation6 + $0xc8] ss:$16 sps:$4 sm:$0xff]   ;;  %v1393_v42 = vld [vmem:[#allocation8] sm:$0xff]  }
  0x44   :  { %v1384_v36 = vld [vmem:[#allocation3 + $0x18] sm:$0xff]   ;;  %v1394_v43 = vld [vmem:[#allocation8 + $0x48] sm:$0xff]   ;;  %v1396_v45 = vld [vmem:[#allocation8 + $0x50] sm:$0xff]   ;;  %p1609_p13 = por %p1608_p12, %p1607_p11 }
  0x45   :  { %v1385_v37 = vld [vmem:[#allocation3 + $0x38] sm:$0xff]   ;;  %v1395_v44 = vld [vmem:[#allocation8 + $0x8] sm:$0xff]   ;;  %v1397_v46 = vld [vmem:[#allocation8 + $0x10] sm:$0xff]  }
  0x46   :  { %340 = vmatpush1.bf16.msra.mxu0 %v1347_v8  ;;  %1320 = vmatpush1.bf16.msra.mxu1 %v1347_v8  ;;  %v1391_v39 = vld [vmem:[#allocation6 + $0xec] ss:$16 sps:$4 sm:$0xff]   ;;  %v1389_v40 = vld [vmem:[#allocation6 + $0xe8] ss:$16 sps:$4 sm:$0xff]   ;;  %v1400_v49 = vld [vmem:[#allocation8 + $0x60] sm:$0xff]   ;;  %p1610_p0 = pnand %p1609_p13, %p1603_p10 }
  0x47   :  { %341 = vmatprep.subr.bf16.mxu0 %v1348_v9  ;;  %1313 = vmatprep.subr.bf16.mxu1 %v1348_v9  ;;  %v1398_v47 = vld [vmem:[#allocation8 + $0x58] sm:$0xff]   ;;  %v1401_v50 = vld [vmem:[#allocation8 + $0x20] sm:$0xff]   ;;  %v1402_v51 = vld [vmem:[#allocation8 + $0x68] sm:$0xff]  }
  0x48   :  { %v1399_v48 = vld [vmem:[#allocation8 + $0x18] sm:$0xff]   ;;  %v1403_v52 = vld [vmem:[#allocation8 + $0x28] sm:$0xff]   ;;  %v1404_v53 = vld [vmem:[#allocation8 + $0x70] sm:$0xff]  }
  0x49   :  { %v1405_v54 = vld [vmem:[#allocation8 + $0x30] sm:$0xff]   ;;  %v1406_v55 = vld [vmem:[#allocation8 + $0x78] sm:$0xff]  }
  0x4a   :  { %342 = vmatpush1.bf16.msra.mxu0 %v1350_v10  ;;  %1321 = vmatpush1.bf16.msra.mxu1 %v1350_v10  ;;  %v1407_v56 = vld [vmem:[#allocation8 + $0x38] sm:$0xff]  }
  0x4b   :  { %343 = vmatprep.subr.bf16.mxu0 %v1351_v11  ;;  %1314 = vmatprep.subr.bf16.mxu1 %v1351_v11 }
  0x4e   :  { %344 = vmatpush1.bf16.msra.mxu0 %v1353_v12  ;;  %1322 = vmatpush1.bf16.msra.mxu1 %v1353_v12 }
  0x4f   :  { %345 = vmatprep.subr.bf16.mxu0 %v1354_v13  ;;  %1315 = vmatprep.subr.bf16.mxu1 %v1354_v13 }
  0x52   :  { %346 = vmatpush1.bf16.msra.mxu0 %v1356_v14  ;;  %1323 = vmatpush1.bf16.msra.mxu1 %v1356_v14 }
  0x53   :  { %347 = vmatprep.subr.bf16.mxu0 %v1357_v15  ;;  %1316 = vmatprep.subr.bf16.mxu1 %v1357_v15 }
  0x56   :  { %348 = vmatpush1.bf16.msra.mxu0 %v1359_v16  ;;  %1324 = vmatpush1.bf16.msra.mxu1 %v1359_v16 }
  0x57   :  { %446 = vmatprep.subr.bf16.mxu1 %v1364_v19  ;;  %1245 = vmatprep.subr.bf16.mxu0 %v1392_v41 }
  0x59   :  { %366 = vmatmul.mubr.bf16.vlgmr.msra.gmra.mrb[0].mxu0 %v1360_v17  ;;  %406 = vmatmul.mubr.bf16.vlgmr.msra.gmra.mrb[0].mxu1 %v1699_v18 }
  0x5a   :  { %447 = vmatpush1.bf16.msra.mxu1 %v1362_v20  ;;  %375 = vmatprep.mubr.bf16.mxu0 %v1637_v0 }
  0x5b   :  { %448 = vmatprep.subr.bf16.mxu1 %v1367_v21  ;;  %415 = vmatprep.mubr.bf16.mxu1 %v1637_v0 }
  0x5c   :  { %1246 = vmatpush3.bf16.msra.mxu0 %v1393_v42 }
  0x5d   :  { %1247 = vmatprep.subr.bf16.mxu0 %v1394_v43 }
  0x5e   :  { %449 = vmatpush1.bf16.msra.mxu1 %v1365_v22 }
  0x5f   :  { %450 = vmatprep.subr.bf16.mxu1 %v1372_v23 }
  0x60   :  { %1248 = vmatpush3.bf16.msra.mxu0 %v1395_v44 }
  0x61   :  { %376 = vmatmul.mubr.bf16.gmra.mrb[4].mxu0 %v1368_v24  ;;  %416 = vmatmul.mubr.bf16.gmra.mrb[4].mxu1 %v1369_v25 }
  0x62   :  { %451 = vmatpush1.bf16.msra.mxu1 %v1370_v26  ;;  %385 = vmatprep.mubr.bf16.mxu0 %v1637_v0 }
  0x63   :  { %452 = vmatprep.subr.bf16.mxu1 %v1375_v27  ;;  %425 = vmatprep.mubr.bf16.mxu1 %v1637_v0 }
  0x64   :  { %1249 = vmatprep.subr.bf16.mxu0 %v1396_v45 }
  0x65   :  { %1250 = vmatpush3.bf16.msra.mxu0 %v1397_v46 }
  0x66   :  { %453 = vmatpush1.bf16.msra.mxu1 %v1373_v28  ;;  %1251 = vmatprep.subr.bf16.mxu0 %v1398_v47 }
  0x67   :  { %454 = vmatprep.subr.bf16.mxu1 %v1380_v29 }
  0x69   :  { %386 = vmatmul.mubr.bf16.gmra.mrb[8].mxu0 %v1376_v30  ;;  %426 = vmatmul.mubr.bf16.gmra.mrb[8].mxu1 %v1377_v31 }
  0x6a   :  { %455 = vmatpush1.bf16.msra.mxu1 %v1378_v32  ;;  %395 = vmatprep.mubr.bf16.mxu0 %v1637_v0 }
  0x6b   :  { %456 = vmatprep.subr.bf16.mxu1 %v1383_v33  ;;  %435 = vmatprep.mubr.bf16.mxu1 %v1637_v0 }
  0x6c   :  { %1252 = vmatpush3.bf16.msra.mxu0 %v1399_v48 }
  0x6d   :  { %1253 = vmatprep.subr.bf16.mxu0 %v1400_v49 }
  0x6e   :  { %457 = vmatpush1.bf16.msra.mxu1 %v1381_v34 }
  0x6f   :  { %458 = vmatprep.subr.bf16.mxu1 %v1388_v35 }
  0x70   :  { %1254 = vmatpush3.bf16.msra.mxu0 %v1401_v50 }
  0x71   :  { %396 = vmatmul.mubr.bf16.gmra.mrb[12].mxu0 %v1384_v36  ;;  %436 = vmatmul.mubr.bf16.gmra.mrb[12].mxu1 %v1385_v37 }
  0x72   :  { %459 = vmatpush1.bf16.msra.mxu1 %v1386_v38  ;;  %478 = vmatprep.mubr.bf16.mxu1 %v1637_v0 }
  0x73   :  { %460 = vmatprep.subr.bf16.mxu1 %v1391_v39  ;;  %1255 = vmatprep.subr.bf16.mxu0 %v1402_v51 }
  0x74   :  { %1256 = vmatpush3.bf16.msra.mxu0 %v1403_v52 }
  0x75   :  { %1257 = vmatprep.subr.bf16.mxu0 %v1404_v53 }
  0x76   :  { %461 = vmatpush1.bf16.msra.mxu1 %v1389_v40 }
  0x78   :  { %1258 = vmatpush3.bf16.msra.mxu0 %v1405_v54 }
  0x79   :  { %479 = vmatmul.mubr.bf16.vlgmr.msra.gmra.mrb[16].mxu1 %v1360_v17  ;;  %1259 = vmatprep.subr.bf16.mxu0 %v1406_v55 }
  0x7a   :  { %488 = vmatprep.mubr.bf16.mxu1 %v1637_v0 }
  0x7c   :  { %1260 = vmatpush3.bf16.msra.mxu0 %v1407_v56 }
  0x81   :  { %489 = vmatmul.mubr.bf16.gmra.mrb[20].mxu1 %v1368_v24 }
  0x82   :  { %498 = vmatprep.mubr.bf16.mxu1 %v1637_v0 }
  0x89   :  { %499 = vmatmul.mubr.bf16.gmra.mrb[24].mxu1 %v1376_v30 }
  0x8a   :  { %508 = vmatprep.mubr.bf16.mxu1 %v1637_v0 }
  0x91   :  { %509 = vmatmul.mubr.bf16.gmra.mrb[28].mxu1 %v1384_v36 }
  0x92   :  { %518 = vmatprep.mubr.bf16.mxu1 %v1637_v0 }
  0x99   :  { %519 = vmatmul.mubr.bf16.gmra.mrb[32].mxu1 %v1699_v18 }
  0x9a   :  { %528 = vmatprep.mubr.bf16.mxu1 %v1637_v0 }
  0xa1   :  { %529 = vmatmul.mubr.bf16.gmra.mrb[36].mxu1 %v1369_v25 }
  0xa2   :  { %538 = vmatprep.mubr.bf16.mxu1 %v1637_v0 }
  0xa9   :  { %539 = vmatmul.mubr.bf16.gmra.mrb[40].mxu1 %v1377_v31 }
  0xaa   :  { %548 = vmatprep.mubr.bf16.mxu1 %v1637_v0 }
  0xb1   :  { %549 = vmatmul.mubr.bf16.gmra.mrb[44].mxu1 %v1385_v37 }
 0x12c   :  { %v1717_v57 = vpop.f32.mrb[0].mxu0  ;;  %v1719_v58 = vpop.f32.mrb[0].mxu1 }
 0x12d   :  { %v1197_v59 = vmul.f32 -1.442695, %v1717_v57  ;;  %v1722_v60 = vpop.f32.mrb[1].mxu0  ;;  %v1724_v61 = vpop.f32.mrb[1].mxu1  ;;  %v1213_v5 = vmul.f32 -1.442695, %v1719_v58 }
 0x12e   :  { %v1198_v62 = vmul.f32 -1.442695, %v1722_v60  ;;  %v1727_v63 = vpop.f32.mrb[2].mxu0  ;;  %v1729_v0 = vpop.f32.mrb[2].mxu1  ;;  %v1214_v11 = vmul.f32 -1.442695, %v1724_v61 }
 0x12f   :  { %1408 = vpow2.f32 %v1197_v59  ;;  %v1199_v1 = vmul.f32 -1.442695, %v1727_v63  ;;  %v1732_v2 = vpop.f32.mrb[3].mxu0  ;;  %v1734_v3 = vpop.f32.mrb[3].mxu1  ;;  %v1215_v18 = vmul.f32 -1.442695, %v1729_v0 }
 0x130   :  { %1410 = vpow2.f32 %v1198_v62  ;;  %v1200_v4 = vmul.f32 -1.442695, %v1732_v2  ;;  %v1216_v20 = vmul.f32 -1.442695, %v1734_v3 }
 0x131   :  { %1412 = vpow2.f32 %v1199_v1 }
 0x132   :  { %1414 = vpow2.f32 %v1200_v4 }
 0x134   :  { %v1738_v6 = vpop.f32.mrb[4].mxu0  ;;  %v1740_v7 = vpop.f32.mrb[4].mxu1 }
 0x135   :  { %v1201_v8 = vmul.f32 -1.442695, %v1738_v6  ;;  %v1743_v9 = vpop.f32.mrb[5].mxu0  ;;  %v1745_v10 = vpop.f32.mrb[5].mxu1  ;;  %v1217_v27 = vmul.f32 -1.442695, %v1740_v7 }
 0x136   :  { %v1202_v12 = vmul.f32 -1.442695, %v1743_v9  ;;  %v1749_v13 = vpop.f32.mrb[6].mxu0  ;;  %v1751_v14 = vpop.f32.mrb[6].mxu1  ;;  %v1218_v35 = vmul.f32 -1.442695, %v1745_v10 }
 0x137   :  { %1416 = vpow2.f32 %v1201_v8  ;;  %v1203_v15 = vmul.f32 -1.442695, %v1749_v13  ;;  %v1754_v16 = vpop.f32.mrb[7].mxu0  ;;  %v1756_v17 = vpop.f32.mrb[7].mxu1 }
 0x138   :  { %1418 = vpow2.f32 %v1213_v5  ;;  %v1204_v51 = vmul.f32 -1.442695, %v1754_v16 }
 0x139   :  { %v1409_v19 = vpop.eup %1408  ;;  %1420 = vpow2.f32 %v1202_v12 }
 0x13a   :  { %v655_v21 = vadd.f32 1.0, %v1409_v19  ;;  %1422 = vpow2.f32 %v1214_v11  ;;  %v1411_v22 = vpop.eup %1410 }
 0x13b   :  { %1424 = vpow2.f32 %v1203_v15  ;;  %v656_v23 = vadd.f32 1.0, %v1411_v22  ;;  %v1413_v26 = vpop.eup %1412 }
 0x13c   :  { %1426 = vpow2.f32 %v1215_v18  ;;  %v1760_v24 = vpop.f32.mrb[8].mxu0  ;;  %v1762_v25 = vpop.f32.mrb[8].mxu1  ;;  %v657_v29 = vadd.f32 1.0, %v1413_v26 }
 0x13d   :  { %1428 = vpow2.f32 %v1216_v20  ;;  %v1765_v28 = vpop.f32.mrb[9].mxu0  ;;  %v1767_v30 = vpop.f32.mrb[9].mxu1  ;;  %v1205_v1 = vmul.f32 -1.442695, %v1760_v24 }
 0x13e   :  { %1430 = vrcp.f32 %v655_v21  ;;  %v1769_v31 = vpop.f32.mrb[10].mxu0  ;;  %v1415_v32 = vpop.eup %1414  ;;  %v1206_v12 = vmul.f32 -1.442695, %v1765_v28 }
 0x13f   :  { %1432 = vrcp.f32 %v656_v23  ;;  %v1771_v33 = vpop.f32.mrb[10].mxu1  ;;  %v658_v34 = vadd.f32 1.0, %v1415_v32  ;;  %v1774_v36 = vpop.f32.mrb[11].mxu0  ;;  %v1207_v22 = vmul.f32 -1.442695, %v1769_v31 }
 0x140   :  { %1434 = vrcp.f32 %v657_v29  ;;  %v1776_v37 = vpop.f32.mrb[11].mxu1 }
 0x141   :  { %v1417_v38 = vpop.eup %1416  ;;  %1436 = vpow2.f32 %v1217_v27  ;;  %v1219_v27 = vmul.f32 -1.442695, %v1751_v14 }
 0x142   :  { %v1419_v39 = vpop.eup %1418  ;;  %1438 = vrcp.f32 %v658_v34  ;;  %v659_v40 = vadd.f32 1.0, %v1417_v38 }
 0x143   :  { %v1421_v41 = vpop.eup %1420  ;;  %1440 = vpow2.f32 %v1218_v35  ;;  %v671_v47 = vadd.f32 1.0, %v1419_v39 }
 0x144   :  { %v1423_v42 = vpop.eup %1422  ;;  %v660_v43 = vadd.f32 1.0, %v1421_v41  ;;  %v1778_v44 = vpop.f32.mrb[12].mxu0  ;;  %1442 = vrcp.f32 %v659_v40 }
 0x145   :  { %v1780_v45 = vpop.f32.mrb[12].mxu1  ;;  %v1425_v46 = vpop.eup %1424  ;;  %v672_v55 = vadd.f32 1.0, %v1423_v42 }
 0x146   :  { %v1782_v48 = vpop.f32.mrb[13].mxu0  ;;  %v1427_v49 = vpop.eup %1426  ;;  %v661_v50 = vadd.f32 1.0, %v1425_v46  ;;  %1444 = vrcp.f32 %v660_v43 }
 0x147   :  { %v1785_v52 = vpop.f32.mrb[13].mxu1  ;;  %v1787_v53 = vpop.f32.mrb[14].mxu0  ;;  %v673_v8 = vadd.f32 1.0, %v1427_v49 }
 0x148   :  { %v1429_v54 = vpop.eup %1428  ;;  %v1789_v56 = vpop.f32.mrb[14].mxu1  ;;  %1446 = vrcp.f32 %v661_v50 }
 0x149   :  { %v1791_v59 = vpop.f32.mrb[15].mxu0  ;;  %v1431_v62 = vpop.eup %1430  ;;  %1448 = vrcp.f32 %v671_v47  ;;  %v674_v19 = vadd.f32 1.0, %v1429_v54 }
 0x14a   :  { %v1794_v4 = vpop.f32.mrb[15].mxu1  ;;  %v1433_v5 = vpop.eup %1432  ;;  %1450 = vpow2.f32 %v1204_v51  ;;  %v751_v18 = vmul.f32 %v1431_v62, %v1717_v57  ;;  %v1208_v57 = vmul.f32 -1.442695, %v1774_v36 }
 0x14b   :  { %v1435_v11 = vpop.eup %1434  ;;  %1452 = vrcp.f32 %v672_v55  ;;  %v752_v21 = vmul.f32 %v1433_v5, %v1722_v60  ;;  %v1221_v5 = vmul.f32 -1.442695, %v1762_v25 }
 0x14c   :  { %v1437_v15 = vpop.eup %1436  ;;  %1454 = vpow2.f32 %v1205_v1  ;;  %v480_v23 = vpop.f32.mrb[16].mxu1  ;;  %v753_v26 = vmul.f32 %v1435_v11, %v1727_v63  ;;  %v1209_v63 = vmul.f32 -1.442695, %v1778_v44 }
 0x14d   :  { %v1439_v20 = vpop.eup %1438  ;;  %1456 = vrcp.f32 %v673_v8  ;;  %v783_v29 = vmul.f32 %v751_v18, %v480_v23  ;;  %v482_v32 = vpop.f32.mrb[17].mxu1  ;;  %v675_v60 = vadd.f32 1.0, %v1437_v15 }
 0x14e   :  { %v1441_v34 = vpop.eup %1440  ;;  %v754_v35 = vmul.f32 %v1439_v20, %v1732_v2  ;;  %1458 = vpow2.f32 %v1206_v12  ;;  %v784_v38 = vmul.f32 %v752_v21, %v482_v32  ;;  %v484_v39 = vpop.f32.mrb[18].mxu1  ;;  %v1220_v2 = vmul.f32 -1.442695, %v1756_v17 }
 0x14f   :  { %1460 = vrcp.f32 %v674_v19  ;;  %v785_v40 = vmul.f32 %v753_v26, %v484_v39  ;;  %v486_v41 = vpop.f32.mrb[19].mxu1  ;;  %v1443_v42 = vpop.eup %1442  ;;  %v676_v47 = vadd.f32 1.0, %v1441_v34  ;;  %v1222_v20 = vmul.f32 -1.442695, %v1767_v30 }
 0x150   :  { %1462 = vpow2.f32 %v1207_v22  ;;  %v786_v43 = vmul.f32 %v754_v35, %v486_v41  ;;  %v1445_v46 = vpop.eup %1444  ;;  %v755_v55 = vmul.f32 %v1443_v42, %v1738_v6  ;;  %v1225_v41 = vmul.f32 -1.442695, %v1780_v45 }
 0x151   :  { %1464 = vpow2.f32 %v1219_v27  ;;  %v831_v49 = vpack.c.bf16 %v785_v40, %v783_v29  ;;  %v756_v1 = vmul.f32 %v1445_v46, %v1743_v9  ;;  %v1223_v29 = vmul.f32 -1.442695, %v1771_v33 }
 0x152   :  { %v1447_v50 = vpop.eup %1446  ;;  %1466 = vpow2.f32 %v1208_v57  ;;  %v832_v51 = vpack.c.bf16 %v786_v43, %v784_v38  ;;  %v1224_v38 = vmul.f32 -1.442695, %v1776_v37 }
 0x153   :  { %v1806_v54 = vpop.eup %1448  ;;  %1468 = vrcp.f32 %v675_v60  ;;  %v757_v12 = vmul.f32 %v1447_v50, %v1749_v13 }
 0x154   :  { %v1451_v62 = vpop.eup %1450  ;;  %1470 = vpow2.f32 %v1209_v63  ;;  %v490_v8 = vpop.f32.mrb[20].mxu1  ;;  %1007 = vmatprep.mubr.bf16.mxu0 %v832_v51 }
 0x155   :  { %v1811_v11 = vpop.eup %1452  ;;  %1472 = vrcp.f32 %v676_v47  ;;  %v662_v15 = vadd.f32 1.0, %v1451_v62  ;;  %v1814_v18 = vmul.f32 %v755_v55, %v490_v8  ;;  %v492_v19 = vpop.f32.mrb[21].mxu1  ;;  %1008 = vmatmul.mubr.bf16.vlgmr.msra.gmra.mrb[16].mxu0 %v831_v49  ;;  %v1210_v55 = vmul.f32 -1.442695, %v1782_v48 }
 0x156   :  { %v1455_v6 = vpop.eup %1454  ;;  %1474 = vpow2.f32 %v1220_v2  ;;  %v1817_v9 = vmul.f32 %v756_v1, %v492_v19  ;;  %v494_v21 = vpop.f32.mrb[22].mxu1 }
 0x157   :  { %v1819_v22 = vpop.eup %1456  ;;  %1476 = vrcp.f32 %v662_v15  ;;  %v663_v23 = vadd.f32 1.0, %v1455_v6  ;;  %v1821_v26 = vmul.f32 %v757_v12, %v494_v21  ;;  %v496_v27 = vpop.f32.mrb[23].mxu1  ;;  %v1211_v12 = vmul.f32 -1.442695, %v1787_v53 }
 0x158   :  { %v1459_v13 = vpop.eup %1458  ;;  %1478 = vpow2.f32 %v1221_v5  ;;  %v1226_v5 = vmul.f32 -1.442695, %v1785_v52  ;;  %v1227_v6 = vmul.f32 -1.442695, %v1789_v56  ;;  %v1212_v21 = vmul.f32 -1.442695, %v1791_v59 }
 0x159   :  { %v1824_v32 = vpop.eup %1460  ;;  %1480 = vrcp.f32 %v663_v23  ;;  %v664_v34 = vadd.f32 1.0, %v1459_v13  ;;  %v833_v35 = vpack.c.bf16 %v1821_v26, %v1814_v18 }
 0x15a   :  { %v1463_v57 = vpop.eup %1462  ;;  %1482 = vpow2.f32 %v1222_v20 }
 0x15b   :  { %v1465_v39 = vpop.eup %1464  ;;  %1484 = vrcp.f32 %v664_v34  ;;  %v665_v60 = vadd.f32 1.0, %v1463_v57 }
 0x15c   :  { %v1467_v40 = vpop.eup %1466  ;;  %1486 = vpow2.f32 %v1223_v29  ;;  %v500_v42 = vpop.f32.mrb[24].mxu1  ;;  %v677_v49 = vadd.f32 1.0, %v1465_v39  ;;  %v1228_v29 = vmul.f32 -1.442695, %v1794_v4 }
 0x15d   :  { %v1830_v63 = vpop.eup %1468  ;;  %1488 = vrcp.f32 %v665_v60  ;;  %v666_v43 = vadd.f32 1.0, %v1467_v40  ;;  %v502_v46 = vpop.f32.mrb[25].mxu1 }
 0x15e   :  { %v1471_v47 = vpop.eup %1470  ;;  %1490 = vpow2.f32 %v1224_v38  ;;  %v504_v50 = vpop.f32.mrb[26].mxu1 }
 0x15f   :  { %v1832_v2 = vpop.eup %1472  ;;  %1492 = vrcp.f32 %v666_v43  ;;  %v667_v51 = vadd.f32 1.0, %v1471_v47  ;;  %v506_v62 = vpop.f32.mrb[27].mxu1 }
 0x160   :  { %v1475_v1 = vpop.eup %1474  ;;  %1494 = vpow2.f32 %v1225_v41 }
 0x161   :  { %v1477_v8 = vpop.eup %1476  ;;  %1496 = vrcp.f32 %v667_v51  ;;  %v678_v39 = vadd.f32 1.0, %v1475_v1 }
 0x162   :  { %v1479_v15 = vpop.eup %1478  ;;  %1498 = vrcp.f32 %v677_v49  ;;  %v758_v19 = vmul.f32 %v1477_v8, %v1754_v16 }
 0x163   :  { %v1481_v20 = vpop.eup %1480  ;;  %1500 = vpow2.f32 %v1210_v55  ;;  %v679_v51 = vadd.f32 1.0, %v1479_v15  ;;  %v767_v15 = vmul.f32 %v1806_v54, %v1719_v58 }
 0x164   :  { %v1483_v23 = vpop.eup %1482  ;;  %v759_v13 = vmul.f32 %v1481_v20, %v1760_v24  ;;  %1502 = vpow2.f32 %v1226_v5  ;;  %v790_v34 = vmul.f32 %v758_v19, %v496_v27  ;;  %v510_v57 = vpop.f32.mrb[28].mxu1 }
 0x165   :  { %v1485_v38 = vpop.eup %1484  ;;  %1504 = vpow2.f32 %v1211_v12  ;;  %v1842_v60 = vpop.f32.mrb[29].mxu1 }
 0x166   :  { %v1487_v16 = vpop.eup %1486  ;;  %v760_v40 = vmul.f32 %v1485_v38, %v1765_v28  ;;  %1506 = vpow2.f32 %v1227_v6  ;;  %v834_v41 = vpack.c.bf16 %v790_v34, %v1817_v9  ;;  %v791_v43 = vmul.f32 %v759_v13, %v500_v42  ;;  %v1846_v47 = vpop.f32.mrb[30].mxu1 }
 0x167   :  { %v1489_v24 = vpop.eup %1488  ;;  %1508 = vpow2.f32 %v1212_v21  ;;  %v1848_v49 = vpop.f32.mrb[31].mxu1  ;;  %v680_v28 = vadd.f32 1.0, %v1483_v23  ;;  %v681_v19 = vadd.f32 1.0, %v1487_v16 }
 0x168   :  { %v1491_v27 = vpop.eup %1490  ;;  %v761_v55 = vmul.f32 %v1489_v24, %v1769_v31  ;;  %1510 = vpow2.f32 %v1228_v29  ;;  %1015 = vmatprep.mubr.bf16.mxu0 %v834_v41  ;;  %v792_v1 = vmul.f32 %v760_v40, %v502_v46  ;;  %v768_v31 = vmul.f32 %v1811_v11, %v1724_v61 }
 0x169   :  { %v1493_v5 = vpop.eup %1492  ;;  %1512 = vrcp.f32 %v678_v39  ;;  %1016 = vmatmul.mubr.bf16.gmra.mrb[20].mxu0 %v833_v35  ;;  %v769_v46 = vmul.f32 %v1819_v22, %v1729_v0  ;;  %v682_v58 = vadd.f32 1.0, %v1491_v27  ;;  %v771_v24 = vmul.f32 %v1830_v63, %v1740_v7 }
 0x16a   :  { %v1495_v9 = vpop.eup %1494  ;;  %v762_v42 = vmul.f32 %v1493_v5, %v1774_v36  ;;  %v793_v8 = vmul.f32 %v761_v55, %v504_v50  ;;  %1514 = vrcp.f32 %v679_v51  ;;  %v770_v50 = vmul.f32 %v1824_v32, %v1734_v3 }
 0x16b   :  { %v1497_v12 = vpop.eup %1496  ;;  %1516 = vrcp.f32 %v680_v28  ;;  %v683_v16 = vadd.f32 1.0, %v1495_v9  ;;  %v772_v51 = vmul.f32 %v1832_v2, %v1745_v10 }
 0x16c   :  { %v1499_v6 = vpop.eup %1498  ;;  %v763_v18 = vmul.f32 %v1497_v12, %v1778_v44  ;;  %v835_v26 = vpack.c.bf16 %v793_v8, %v791_v43  ;;  %v794_v35 = vmul.f32 %v762_v42, %v506_v62  ;;  %v520_v20 = vpop.f32.mrb[32].mxu1  ;;  %1518 = vrcp.f32 %v681_v19 }
 0x16d   :  { %v1501_v36 = vpop.eup %1500  ;;  %v1864_v54 = vmul.f32 %v767_v15, %v520_v20  ;;  %v522_v61 = vpop.f32.mrb[33].mxu1  ;;  %v773_v5 = vmul.f32 %v1499_v6, %v1751_v14 }
 0x16e   :  { %v1503_v11 = vpop.eup %1502  ;;  %v668_v21 = vadd.f32 1.0, %v1501_v36  ;;  %v836_v0 = vpack.c.bf16 %v794_v35, %v792_v1  ;;  %v1866_v22 = vmul.f32 %v763_v18, %v510_v57  ;;  %v1868_v23 = vmul.f32 %v768_v31, %v522_v61  ;;  %v524_v44 = vpop.f32.mrb[34].mxu1 }
 0x16f   :  { %v1505_v13 = vpop.eup %1504  ;;  %v1870_v62 = vmul.f32 %v769_v46, %v524_v44  ;;  %v526_v29 = vpop.f32.mrb[35].mxu1  ;;  %v684_v27 = vadd.f32 1.0, %v1503_v11 }
 0x170   :  { %v1507_v34 = vpop.eup %1506  ;;  %1520 = vrcp.f32 %v668_v21  ;;  %v669_v3 = vadd.f32 1.0, %v1505_v13  ;;  %1023 = vmatprep.mubr.bf16.mxu0 %v836_v0  ;;  %v1872_v32 = vmul.f32 %v770_v50, %v526_v29 }
 0x171   :  { %v1509_v38 = vpop.eup %1508  ;;  %1522 = vrcp.f32 %v682_v58  ;;  %1024 = vmatmul.mubr.bf16.gmra.mrb[24].mxu0 %v835_v26  ;;  %v839_v57 = vpack.c.bf16 %v1870_v62, %v1864_v54  ;;  %v685_v55 = vadd.f32 1.0, %v1507_v34 }
 0x172   :  { %v1511_v39 = vpop.eup %1510  ;;  %1524 = vrcp.f32 %v669_v3  ;;  %v670_v40 = vadd.f32 1.0, %v1509_v38  ;;  %v840_v41 = vpack.c.bf16 %v1872_v32, %v1868_v23 }
 0x173   :  { %v1513_v43 = vpop.eup %1512  ;;  %v686_v28 = vadd.f32 1.0, %v1511_v39 }
 0x174   :  { %1526 = vrcp.f32 %v670_v40  ;;  %v530_v1 = vpop.f32.mrb[36].mxu1  ;;  %v1515_v8 = vpop.eup %1514  ;;  %v774_v12 = vmul.f32 %v1513_v43, %v1756_v17 }
 0x175   :  { %v1883_v9 = vmul.f32 %v771_v24, %v530_v1  ;;  %v532_v42 = vpop.f32.mrb[37].mxu1  ;;  %1528 = vrcp.f32 %v683_v16  ;;  %v1517_v7 = vpop.eup %1516  ;;  %v775_v26 = vmul.f32 %v1515_v8, %v1762_v25 }
 0x176   :  { %v804_v15 = vmul.f32 %v772_v51, %v532_v42  ;;  %v534_v31 = vpop.f32.mrb[38].mxu1  ;;  %1530 = vrcp.f32 %v684_v27  ;;  %v1519_v2 = vpop.eup %1518  ;;  %v776_v20 = vmul.f32 %v1517_v7, %v1767_v30 }
 0x177   :  { %v805_v63 = vmul.f32 %v773_v5, %v534_v31  ;;  %v536_v46 = vpop.f32.mrb[39].mxu1  ;;  %1532 = vrcp.f32 %v685_v55  ;;  %v777_v50 = vmul.f32 %v1519_v2, %v1771_v33 }
 0x178   :  { %v806_v10 = vmul.f32 %v774_v12, %v536_v46  ;;  %1534 = vrcp.f32 %v686_v28 }
 0x179   :  { %v841_v14 = vpack.c.bf16 %v805_v63, %v1883_v9 }
 0x17a   :  { %v1521_v19 = vpop.eup %1520  ;;  %v842_v6 = vpack.c.bf16 %v806_v10, %v804_v15 }
 0x17b   :  { %v1523_v18 = vpop.eup %1522  ;;  %v764_v17 = vmul.f32 %v1521_v19, %v1782_v48 }
 0x17c   :  { %v1525_v35 = vpop.eup %1524  ;;  %v540_v36 = vpop.f32.mrb[40].mxu1  ;;  %v778_v44 = vmul.f32 %v1523_v18, %v1776_v37 }
 0x17d   :  { %v765_v58 = vmul.f32 %v1525_v35, %v1787_v53  ;;  %v796_v61 = vmul.f32 %v764_v17, %v1842_v60  ;;  %v807_v11 = vmul.f32 %v775_v26, %v540_v36  ;;  %v542_v21 = vpop.f32.mrb[41].mxu1 }
 0x17e   :  { %v1527_v0 = vpop.eup %1526  ;;  %v808_v13 = vmul.f32 %v776_v20, %v542_v21  ;;  %v544_v29 = vpop.f32.mrb[42].mxu1 }
 0x17f   :  { %v766_v25 = vmul.f32 %v1527_v0, %v1791_v59  ;;  %v797_v48 = vmul.f32 %v765_v58, %v1846_v47  ;;  %v809_v34 = vmul.f32 %v777_v50, %v544_v29  ;;  %v546_v30 = vpop.f32.mrb[43].mxu1  ;;  %v1529_v3 = vpop.eup %1528 }
 0x180   :  { %v810_v38 = vmul.f32 %v778_v44, %v546_v30  ;;  %v1531_v33 = vpop.eup %1530  ;;  %v779_v37 = vmul.f32 %v1529_v3, %v1780_v45 }
 0x181   :  { %v837_v53 = vpack.c.bf16 %v797_v48, %v1866_v22  ;;  %v798_v60 = vmul.f32 %v766_v25, %v1848_v49  ;;  %v843_v39 = vpack.c.bf16 %v809_v34, %v807_v11  ;;  %v1533_v16 = vpop.eup %1532  ;;  %v780_v59 = vmul.f32 %v1531_v33, %v1785_v52 }
 0x182   :  { %v844_v40 = vpack.c.bf16 %v810_v38, %v808_v13  ;;  %v1535_v43 = vpop.eup %1534  ;;  %v781_v47 = vmul.f32 %v1533_v16, %v1789_v56 }
 0x183   :  { %v838_v24 = vpack.c.bf16 %v798_v60, %v796_v61  ;;  %v782_v1 = vmul.f32 %v1535_v43, %v1794_v4 }
 0x184   :  { %v550_v27 = vpop.f32.mrb[44].mxu1 }
 0x185   :  { %1031 = vmatprep.mubr.bf16.mxu0 %v838_v24  ;;  %v811_v51 = vmul.f32 %v779_v37, %v550_v27  ;;  %v552_v55 = vpop.f32.mrb[45].mxu1 }
 0x186   :  { %1032 = vmatmul.mubr.bf16.gmra.mrb[28].mxu0 %v837_v53  ;;  %v812_v22 = vmul.f32 %v780_v59, %v552_v55  ;;  %v554_v49 = vpop.f32.mrb[46].mxu1 }
 0x187   :  { %1039 = vmatprep.mubr.bf16.mxu0 %v840_v41  ;;  %v813_v5 = vmul.f32 %v781_v47, %v554_v49  ;;  %v556_v45 = vpop.f32.mrb[47].mxu1 }
 0x188   :  { %v814_v28 = vmul.f32 %v782_v1, %v556_v45 }
 0x189   :  { %v845_v9 = vpack.c.bf16 %v813_v5, %v811_v51 }
 0x18a   :  { %v846_v52 = vpack.c.bf16 %v814_v28, %v812_v22 }
 0x18e   :  { %1040 = vmatmul.mubr.bf16.gmra.mrb[32].mxu0 %v839_v57 }
 0x18f   :  { %1047 = vmatprep.mubr.bf16.mxu0 %v842_v6 }
 0x196   :  { %1048 = vmatmul.mubr.bf16.gmra.mrb[36].mxu0 %v841_v14 }
 0x197   :  { %1055 = vmatprep.mubr.bf16.mxu0 %v844_v40 }
 0x19e   :  { %1056 = vmatmul.mubr.bf16.gmra.mrb[40].mxu0 %v843_v39 }
 0x19f   :  { %1063 = vmatprep.mubr.bf16.mxu0 %v846_v52 }
 0x1a6   :  { %1064 = vmatmul.mubr.bf16.gmra.mrb[44].mxu0 %v845_v9 }
 0x228   :  { %v1261_v56 = vpop.f32.mrb[16].mxu0 }
 0x229   :  { %v1262_v4 = vpop.f32.mrb[17].mxu0 }
 0x22a   :  { %v1263_v42 = vadd.f32 %v1262_v4, %v1261_v56  ;;  %v1264_v23 = vpop.f32.mrb[18].mxu0 }
 0x22b   :  { %v1265_v32 = vpop.f32.mrb[19].mxu0 }
 0x22c   :  { %1123 = vst [vmem:[#allocation9] sm:$0xff] %v1263_v42  ;;  %v1266_v41 = vadd.f32 %v1265_v32, %v1264_v23 }
 0x22e   :  { %1124 = vst [vmem:[#allocation9 + $0x8] sm:$0xff] %v1266_v41 }
 0x23c   :  { %v1267_v8 = vpop.f32.mrb[20].mxu0 }
 0x23d   :  { %v1268_v12 = vpop.f32.mrb[21].mxu0 }
 0x23e   :  { %v1269_v15 = vadd.f32 %v1268_v12, %v1267_v8  ;;  %v1270_v31 = vpop.f32.mrb[22].mxu0 }
 0x23f   :  { %v1271_v54 = vpop.f32.mrb[23].mxu0 }
 0x240   :  { %1125 = vst [vmem:[#allocation9 + $0x10] sm:$0xff] %v1269_v15  ;;  %v1272_v62 = vadd.f32 %v1271_v54, %v1270_v31 }
 0x242   :  { %1126 = vst [vmem:[#allocation9 + $0x18] sm:$0xff] %v1272_v62 }
 0x244   :  { %v1273_v57 = vpop.f32.mrb[24].mxu0 }
 0x245   :  { %v1274_v7 = vpop.f32.mrb[25].mxu0 }
 0x246   :  { %v1275_v63 = vadd.f32 %v1274_v7, %v1273_v57  ;;  %v1276_v46 = vpop.f32.mrb[26].mxu0 }
 0x247   :  { %v1277_v10 = vpop.f32.mrb[27].mxu0 }
 0x248   :  { %1127 = vst [vmem:[#allocation9 + $0x20] sm:$0xff] %v1275_v63  ;;  %v1278_v2 = vadd.f32 %v1277_v10, %v1276_v46 }
 0x24a   :  { %1128 = vst [vmem:[#allocation9 + $0x28] sm:$0xff] %v1278_v2 }
 0x259   :  { %v1279_v14 = vpop.f32.mrb[28].mxu0 }
 0x25a   :  { %v1280_v19 = vpop.f32.mrb[29].mxu0 }
 0x25b   :  { %v1281_v6 = vadd.f32 %v1280_v19, %v1279_v14  ;;  %v1282_v18 = vpop.f32.mrb[30].mxu0 }
 0x25c   :  { %v1283_v26 = vpop.f32.mrb[31].mxu0 }
 0x25d   :  { %1129 = vst [vmem:[#allocation9 + $0x30] sm:$0xff] %v1281_v6  ;;  %v1284_v17 = vadd.f32 %v1283_v26, %v1282_v18 }
 0x25f   :  { %1130 = vst [vmem:[#allocation9 + $0x38] sm:$0xff] %v1284_v17 }
 0x261   :  { %v1285_v35 = vpop.f32.mrb[32].mxu0 }
 0x262   :  { %v1286_v20 = vpop.f32.mrb[33].mxu0 }
 0x263   :  { %v1287_v36 = vadd.f32 %v1286_v20, %v1285_v35  ;;  %v1288_v50 = vpop.f32.mrb[34].mxu0 }
 0x264   :  { %v1289_v58 = vpop.f32.mrb[35].mxu0 }
 0x265   :  { %1131 = vst [vmem:[#allocation9 + $0x40] sm:$0xff] %v1287_v36  ;;  %v1290_v61 = vadd.f32 %v1289_v58, %v1288_v50 }
 0x267   :  { %1132 = vst [vmem:[#allocation9 + $0x48] sm:$0xff] %v1290_v61 }
 0x269   :  { %v1291_v11 = vpop.f32.mrb[36].mxu0 }
 0x26a   :  { %v1292_v21 = vpop.f32.mrb[37].mxu0 }
 0x26b   :  { %v1293_v0 = vadd.f32 %v1292_v21, %v1291_v11  ;;  %v1294_v44 = vpop.f32.mrb[38].mxu0 }
 0x26c   :  { %v1295_v13 = vpop.f32.mrb[39].mxu0 }
 0x26d   :  { %1133 = vst [vmem:[#allocation9 + $0x50] sm:$0xff] %v1293_v0  ;;  %v1296_v29 = vadd.f32 %v1295_v13, %v1294_v44 }
 0x26f   :  { %1134 = vst [vmem:[#allocation9 + $0x58] sm:$0xff] %v1296_v29 }
 0x271   :  { %v1297_v25 = vpop.f32.mrb[40].mxu0 }
 0x272   :  { %v1298_v48 = vpop.f32.mrb[41].mxu0 }
 0x273   :  { %v1299_v34 = vadd.f32 %v1298_v48, %v1297_v25  ;;  %v1300_v30 = vpop.f32.mrb[42].mxu0 }
 0x274   :  { %v1301_v3 = vpop.f32.mrb[43].mxu0 }
 0x275   :  { %1135 = vst [vmem:[#allocation9 + $0x60] sm:$0xff] %v1299_v34  ;;  %v1302_v38 = vadd.f32 %v1301_v3, %v1300_v30 }
 0x277   :  { %1136 = vst [vmem:[#allocation9 + $0x68] sm:$0xff] %v1302_v38 }
 0x279   :  { %v1303_v33 = vpop.f32.mrb[44].mxu0 }
 0x27a   :  { %v1304_v53 = vpop.f32.mrb[45].mxu0 }
 0x27b   :  { %v1305_v60 = vadd.f32 %v1304_v53, %v1303_v33  ;;  %v1306_v39 = vpop.f32.mrb[46].mxu0 }
 0x27c   :  { %v1307_v16 = vpop.f32.mrb[47].mxu0 }
 0x27d   :  { %1137 = vst [vmem:[#allocation9 + $0x70] sm:$0xff] %v1305_v60  ;;  %v1308_v40 = vadd.f32 %v1307_v16, %v1306_v39 }
 0x27f   :  { %1138 = vst [vmem:[#allocation9 + $0x78] sm:$0xff] %v1308_v40 }
 0x280   :  { %1613 = shalt.err (!%p1610_p0)
}
 0x281   :  { %s1614_s27 = scalar_lea.hbm %s1923_s3, 2048 }
 0x282   :  { %p1615_p1 = scmp.ne.s32.totalorder %s1923_s3, %s1614_s27  ;;  %p1618_p2 = scmp.lt.u32.totalorder %s1614_s27, %s1923_s3 }
 0x284   :  { %p1620_p3 = pnand %p1618_p2, %p1615_p1 }
 0x286   :  { %1623 = shalt.err (!%p1620_p3)
}
 0x287   :  { %s1639_s5 = smov 128   ;;  %s1640_s6 = smov 8  }
 0x288   :  { %1150 = dma.vmem_to_hbm [thread:$0]  %s1145_s23, 2048, %s1923_s3, [#allocation5], %s1639_s5, %s1639_s5, %s1640_s6  }
 0x289   :  { %1628 = dma.done.wait [#allocation5], 2048  }
 0x28a   :  { %1629 = vsyncadd [#allocation5], 4294965248 }
 0x28b   :  { %1154 = vsyncpa [#allocation4], 1 }
 0x28c   :  { %1155 = vsyncpa [#allocation7], 1 }
 0x28d   :  { %1156 = vsyncpa [#allocation5], 1 }

</bundles_post_ra>
